<compile_context>
chip_gen: v7x
topology: tpu7x:2x2x1
jax: 0.10.0
libtpu: 0.0.40
codegen_flags: <defaults>
</compile_context>

<pallas_src>
import jax
import jax.numpy as jnp
from jax import lax
from jax.experimental import pallas as pl
from jax.experimental.pallas import tpu as pltpu

# Problem sizes (small, consistent with a phase-space ODE state).
B = 8        # batch (number of bodies / systems)
D = 4        # phase-space coordinate dimension
H = 32       # hidden width of each gradient module
L = 4        # number of symplectic layers (alternating up / low)

N_STEPS = 64   # fused integration steps for the trajectory kernel
CHUNK = 32     # integration steps per grid iteration (CHUNK*2*D >= 128 lanes)


# -----------------------------------------------------------------------------
# Host-side parameter packing (folds a, the 0.5 tanh factor, and K^T).
# -----------------------------------------------------------------------------
def _pack_params(K, a, b):
    """K [L,H,D], a [L,1,H], b [L,1,H] -> (KT_half [L*D,H], K2T_half [L*D,H], b_half [L,H])."""
    K = K.astype(jnp.float32)
    a = a.astype(jnp.float32)
    b = b.astype(jnp.float32)
    kt_half = (0.5 * jnp.transpose(K, (0, 2, 1))).reshape(L * D, H)       # rows of 0.5*K^T
    k2_half = 0.5 * (a.reshape(L, H, 1) * K)                              # [L,H,D] = 0.5*diag(a)K
    k2t_half = jnp.transpose(k2_half, (0, 2, 1)).reshape(L * D, H)        # rows = columns of K2_half
    b_half = 0.5 * b.reshape(L, H)
    return kt_half, k2t_half, b_half


# -----------------------------------------------------------------------------
# Shared in-kernel math.
# -----------------------------------------------------------------------------
def _prep_layer_params(kt, k2, bh):
    """Hoisted once per grid iteration: per-layer parameter rows, pre-broadcast."""
    kt_rows, k2_rows, b_rows = [], [], []
    for l in range(L):
        kt_rows.append([jnp.broadcast_to(kt[l * D + d:l * D + d + 1, :], (B, H))
                        for d in range(D)])
        k2_rows.append([jnp.broadcast_to(k2[l * D + d:l * D + d + 1, :], (B, H))
                        for d in range(D)])
        b_rows.append(jnp.broadcast_to(bh[l:l + 1, :], (B, H)))
    return kt_rows, k2_rows, b_rows


def _symplectic_step(q, p, dt, kt_rows, k2_rows, b_rows):
    """One L-layer G-SympNet update; exact f32, VPU/EUP/XLU only (no MXU)."""
    for l in range(L):                                  # static unroll, L is small
        x = q if l % 2 == 0 else p                      # [B, D]
        # z = 0.5*(x @ K_l^T + b_l) as 4 broadcast FMAs (contraction over D=4).
        z = x[:, 0:1] * kt_rows[l][0] + b_rows[l]
        for d in range(1, D):
            z = z + x[:, d:d + 1] * kt_rows[l][d]       # [B, H]
        g = jnp.tanh(z) + 1.0                           # == 2*sigmoid(x@K^T + b), EUP
        # upd = (sigmoid(.)*a_l) @ K_l == g @ (0.5*a_l^T*K_l): multiply + lane-sum per column.
        cols = [jnp.sum(g * k2_rows[l][d], axis=1, keepdims=True) for d in range(D)]
        upd = jnp.concatenate(cols, axis=-1) * dt       # [B, D]
        if l % 2 == 0:
            p = p + upd     # "up" module: update momenta from positions
        else:
            q = q + upd     # "low" module: update positions from momenta
    return q, p


# -----------------------------------------------------------------------------
# Kernel 1: single step (SympNet.forward).
# NOTE: one step is ~16 KFLOP / ~3 KB -> launch/DMA bound on every TPU
# generation; real stepping callers should use the fused trajectory kernel.
# -----------------------------------------------------------------------------
def _sympnet_step_kernel(dt_ref, qp_ref, kt_ref, k2_ref, b_ref, qp_out_ref):
    dt = dt_ref[0]
    kt_rows, k2_rows, b_rows = _prep_layer_params(kt_ref[...], k2_ref[...], b_ref[...])
    q = qp_ref[0].astype(jnp.float32)                   # [B, D]
    p = qp_ref[1].astype(jnp.float32)                   # [B, D]
    q, p = _symplectic_step(q, p, dt, kt_rows, k2_rows, b_rows)
    qp_out_ref[0] = q.astype(qp_out_ref.dtype)
    qp_out_ref[1] = p.astype(qp_out_ref.dtype)


@jax.jit
def sympnet_forward(q, p, m, t, dt, K, a, b):
    """SympNet.forward: (q, p) = hypersolver(q, p, m, t, dt)."""
    del m, t  # not used by this hypersolver (see TODO above)
    kt, k2, bh = _pack_params(K, a, b)
    qp = jnp.stack([q.astype(jnp.float32), p.astype(jnp.float32)], axis=0)   # [2,B,D]
    dt_arr = jnp.asarray(dt, jnp.float32).reshape((1,))
    qp_out = pl.pallas_call(
        _sympnet_step_kernel,
        out_shape=jax.ShapeDtypeStruct((2, B, D), jnp.float32),
        in_specs=[
            pl.BlockSpec(memory_space=pltpu.MemorySpace.SMEM),  # dt scalar
            pl.BlockSpec(memory_space=pltpu.MemorySpace.VMEM),  # qp packed
            pl.BlockSpec(memory_space=pltpu.MemorySpace.VMEM),  # KT_half
            pl.BlockSpec(memory_space=pltpu.MemorySpace.VMEM),  # K2T_half
            pl.BlockSpec(memory_space=pltpu.MemorySpace.VMEM),  # b_half
        ],
        out_specs=pl.BlockSpec(memory_space=pltpu.MemorySpace.VMEM),
        # Alias qp -> qp_out so a stepping caller reuses the state buffer.
        input_output_aliases={1: 0},
    )(dt_arr, qp, kt, k2, bh)
    return qp_out[0], qp_out[1]


# -----------------------------------------------------------------------------
# Kernel 2: fused N-step trajectory (BaseSolver.trajectory driving
# SympNet.forward).  One pallas_call, grid over time chunks, state in VMEM,
# one lane-dense store per chunk.
# -----------------------------------------------------------------------------
def _sympnet_traj_kernel(dt_ref, qp0_ref, kt_ref, k2_ref, b_ref, traj_ref, qp_state):
    c = pl.program_id(0)

    @pl.when(c == 0)
    def _():
        qp_state[...] = qp0_ref[...].astype(jnp.float32)

    # Parameter loads / slices / broadcasts hoisted out of the step loop.
    kt_rows, k2_rows, b_rows = _prep_layer_params(kt_ref[...], k2_ref[...], b_ref[...])

    q = qp_state[0]
    p = qp_state[1]

    pieces = []                              # register-accumulated step results
    for s in range(CHUNK):                   # static unroll; CHUNK*L layer evals
        dt = dt_ref[c * CHUNK + s]           # per-step dt from the SMEM table
        q, p = _symplectic_step(q, p, dt, kt_rows, k2_rows, b_rows)
        pieces.append(jnp.concatenate([q, p], axis=-1))   # [B, 2*D]

    # Single lane-dense store per chunk: [B, CHUNK*2*D] (last dim >= 128).
    traj_ref[0] = jnp.concatenate(pieces, axis=-1).astype(traj_ref.dtype)

    qp_state[0] = q
    qp_state[1] = p


@jax.jit
def sympnet_trajectory(q0, p0, m, times, K, a, b):
    """BaseSolver.trajectory with SympNet.forward, fused into one kernel.

    times: [N+1] time stamps; returns (q_traj, p_traj) each [N+1, B, D] with
    the initial state at index 0 (matching BaseSolver.trajectory stacking).
    """
    del m  # unused by this hypersolver
    n = times.shape[0] - 1
    assert n % CHUNK == 0, "number of steps must be a multiple of CHUNK"
    n_chunks = n // CHUNK
    lanes = CHUNK * 2 * D                                              # 256
    dt_arr = (times[1:] - times[:-1]).astype(jnp.float32)              # [N]
    kt, k2, bh = _pack_params(K, a, b)
    qp0 = jnp.stack([q0.astype(jnp.float32), p0.astype(jnp.float32)], axis=0)  # [2,B,D]

    grid_spec = pltpu.PrefetchScalarGridSpec(
        num_scalar_prefetch=0,
        grid=(n_chunks,),
        in_specs=[
            pl.BlockSpec(memory_space=pltpu.MemorySpace.SMEM),     # dt table [N]
            pl.BlockSpec((2, B, D), lambda c: (0, 0, 0)),          # qp0 packed
            pl.BlockSpec((L * D, H), lambda c: (0, 0)),            # KT_half
            pl.BlockSpec((L * D, H), lambda c: (0, 0)),            # K2T_half
            pl.BlockSpec((L, H), lambda c: (0, 0)),                # b_half
        ],
        out_specs=pl.BlockSpec((1, B, lanes), lambda c: (c, 0, 0)),  # lane-dense slab
        scratch_shapes=[
            pltpu.VMEM((2, B, D), jnp.float32),   # q/p carried across grid steps
        ],
    )

    slab = pl.pallas_call(
        _sympnet_traj_kernel,
        out_shape=jax.ShapeDtypeStruct((n_chunks, B, lanes), jnp.float32),
        grid_spec=grid_spec,
        # Time axis carries state in scratch -> MUST stay "arbitrary" (sequential).
        compiler_params=pltpu.CompilerParams(
            dimension_semantics=("arbitrary",)),
    )(dt_arr, qp0, kt, k2, bh)

    # Unpack the lane-dense slab back to (N, B, D) trajectories (cheap XLA-side).
    traj = slab.reshape(n_chunks, B, CHUNK, 2, D)
    traj = jnp.transpose(traj, (0, 2, 3, 1, 4)).reshape(n, 2, B, D)
    q_traj = jnp.concatenate([q0[None].astype(jnp.float32), traj[:, 0]], axis=0)
    p_traj = jnp.concatenate([p0[None].astype(jnp.float32), traj[:, 1]], axis=0)
    return q_traj, p_traj


# -----------------------------------------------------------------------------
# Pure-JAX references (original sigmoid / matmul formulation, HIGHEST precision).
# -----------------------------------------------------------------------------
def _reference_step(q, p, dt, K, a, b):
    q = q.astype(jnp.float32)
    p = p.astype(jnp.float32)
    for l in range(L):
        Kl, al, bl = K[l], a[l], b[l]
        x = q if l % 2 == 0 else p
        z = lax.dot_general(x, Kl, dimension_numbers=(((1,), (1,)), ((), ())),
                            precision=lax.Precision.HIGHEST,
                            preferred_element_type=jnp.float32)
        h = jax.nn.sigmoid(z + bl)
        upd = dt * lax.dot_general(h * al, Kl,
                                   dimension_numbers=(((1,), (0,)), ((), ())),
                                   precision=lax.Precision.HIGHEST,
                                   preferred_element_type=jnp.float32)
        if l % 2 == 0:
            p = p + upd
        else:
            q = q + upd
    return q, p


def _reference_trajectory(q0, p0, times, K, a, b):
    q, p = q0.astype(jnp.float32), p0.astype(jnp.float32)
    q_traj, p_traj = [q], [p]
    dts = times[1:] - times[:-1]
    for i in range(times.shape[0] - 1):
        q, p = _reference_step(q, p, dts[i], K, a, b)
        q_traj.append(q)
        p_traj.append(p)
    return jnp.stack(q_traj, 0), jnp.stack(p_traj, 0)


def init_params(key):
    """Deterministic parameter init (shapes implied by the gradient modules)."""
    kK, ka, kb = jax.random.split(key, 3)
    K = jax.random.normal(kK, (L, H, D), jnp.float32) * 0.1
    a = jax.random.normal(ka, (L, 1, H), jnp.float32) * 0.1
    b = jax.random.normal(kb, (L, 1, H), jnp.float32) * 0.01
    return K, a, b


if __name__ == "__main__":
    key = jax.random.PRNGKey(0)
    kq, kp, km, kparams = jax.random.split(key, 4)

    q = jax.random.normal(kq, (B, D), jnp.float32)
    p = jax.random.normal(kp, (B, D), jnp.float32)
    m = jnp.abs(jax.random.normal(km, (B, D), jnp.float32)) + 0.5  # masses
    t = jnp.float32(0.0)
    dt = jnp.float32(0.1)

    K, a, b = init_params(kparams)

    # --- single step (SympNet.forward) ---
    q_out, p_out = sympnet_forward(q, p, m, t, dt, K, a, b)
    jax.block_until_ready((q_out, p_out))
    q_ref, p_ref = _reference_step(q, p, dt, K, a, b)
    assert jnp.allclose(q_out, q_ref, atol=1e-5, rtol=1e-5)
    assert jnp.allclose(p_out, p_ref, atol=1e-5, rtol=1e-5)

    # --- fused N-step trajectory (BaseSolver.trajectory) ---
    times = jnp.arange(N_STEPS + 1, dtype=jnp.float32) * jnp.float32(0.05)
    q_traj, p_traj = sympnet_trajectory(q, p, m, times, K, a, b)
    jax.block_until_ready((q_traj, p_traj))
    q_traj_ref, p_traj_ref = _reference_trajectory(q, p, times, K, a, b)
    assert jnp.allclose(q_traj, q_traj_ref, atol=1e-4, rtol=1e-3)
    assert jnp.allclose(p_traj, p_traj_ref, atol=1e-4, rtol=1e-3)

    print("KERNEL_OK")
</pallas_src>

<mosaic_0001>
module attributes {stable_mosaic.version = 11 : i64} {
  func.func @_sympnet_step_kernel(%arg0: memref<1xf32, #tpu.memory_space<smem>>, %arg1: memref<2x8x4xf32, #tpu.memory_space<vmem>>, %arg2: memref<16x32xf32, #tpu.memory_space<vmem>>, %arg3: memref<16x32xf32, #tpu.memory_space<vmem>>, %arg4: memref<4x32xf32, #tpu.memory_space<vmem>>, %arg5: memref<2x8x4xf32, #tpu.memory_space<vmem>>) attributes {dimension_semantics = [], scalar_prefetch = 0 : i64, scratch_operands = 0 : i64, tpu.core_type = #tpu.core_type<tc>} {
    %c0 = arith.constant 0 : index
    %0 = memref.load %arg0[%c0] : memref<1xf32, #tpu.memory_space<smem>>
    %c0_0 = arith.constant 0 : index
    %c0_1 = arith.constant 0 : index
    %1 = vector.load %arg2[%c0_0, %c0_1] : memref<16x32xf32, #tpu.memory_space<vmem>>, vector<16x32xf32>
    %c0_2 = arith.constant 0 : index
    %c0_3 = arith.constant 0 : index
    %2 = vector.load %arg3[%c0_2, %c0_3] : memref<16x32xf32, #tpu.memory_space<vmem>>, vector<16x32xf32>
    %c0_4 = arith.constant 0 : index
    %c0_5 = arith.constant 0 : index
    %3 = vector.load %arg4[%c0_4, %c0_5] : memref<4x32xf32, #tpu.memory_space<vmem>>, vector<4x32xf32>
    %4 = vector.extract_strided_slice %1 {offsets = [0, 0], sizes = [1, 32], strides = [1, 1]} : vector<16x32xf32> to vector<1x32xf32>
    %5 = vector.shape_cast %4 : vector<1x32xf32> to vector<1x32xf32>
    %6 = vector.broadcast %5 : vector<1x32xf32> to vector<8x32xf32>
    %7 = vector.extract_strided_slice %1 {offsets = [1, 0], sizes = [1, 32], strides = [1, 1]} : vector<16x32xf32> to vector<1x32xf32>
    %8 = vector.shape_cast %7 : vector<1x32xf32> to vector<1x32xf32>
    %9 = vector.broadcast %8 : vector<1x32xf32> to vector<8x32xf32>
    %10 = vector.extract_strided_slice %1 {offsets = [2, 0], sizes = [1, 32], strides = [1, 1]} : vector<16x32xf32> to vector<1x32xf32>
    %11 = vector.shape_cast %10 : vector<1x32xf32> to vector<1x32xf32>
    %12 = vector.broadcast %11 : vector<1x32xf32> to vector<8x32xf32>
    %13 = vector.extract_strided_slice %1 {offsets = [3, 0], sizes = [1, 32], strides = [1, 1]} : vector<16x32xf32> to vector<1x32xf32>
    %14 = vector.shape_cast %13 : vector<1x32xf32> to vector<1x32xf32>
    %15 = vector.broadcast %14 : vector<1x32xf32> to vector<8x32xf32>
    %16 = vector.extract_strided_slice %2 {offsets = [0, 0], sizes = [1, 32], strides = [1, 1]} : vector<16x32xf32> to vector<1x32xf32>
    %17 = vector.shape_cast %16 : vector<1x32xf32> to vector<1x32xf32>
    %18 = vector.broadcast %17 : vector<1x32xf32> to vector<8x32xf32>
    %19 = vector.extract_strided_slice %2 {offsets = [1, 0], sizes = [1, 32], strides = [1, 1]} : vector<16x32xf32> to vector<1x32xf32>
    %20 = vector.shape_cast %19 : vector<1x32xf32> to vector<1x32xf32>
    %21 = vector.broadcast %20 : vector<1x32xf32> to vector<8x32xf32>
    %22 = vector.extract_strided_slice %2 {offsets = [2, 0], sizes = [1, 32], strides = [1, 1]} : vector<16x32xf32> to vector<1x32xf32>
    %23 = vector.shape_cast %22 : vector<1x32xf32> to vector<1x32xf32>
    %24 = vector.broadcast %23 : vector<1x32xf32> to vector<8x32xf32>
    %25 = vector.extract_strided_slice %2 {offsets = [3, 0], sizes = [1, 32], strides = [1, 1]} : vector<16x32xf32> to vector<1x32xf32>
    %26 = vector.shape_cast %25 : vector<1x32xf32> to vector<1x32xf32>
    %27 = vector.broadcast %26 : vector<1x32xf32> to vector<8x32xf32>
    %28 = vector.extract_strided_slice %3 {offsets = [0, 0], sizes = [1, 32], strides = [1, 1]} : vector<4x32xf32> to vector<1x32xf32>
    %29 = vector.shape_cast %28 : vector<1x32xf32> to vector<1x32xf32>
    %30 = vector.broadcast %29 : vector<1x32xf32> to vector<8x32xf32>
    %31 = vector.extract_strided_slice %1 {offsets = [4, 0], sizes = [1, 32], strides = [1, 1]} : vector<16x32xf32> to vector<1x32xf32>
    %32 = vector.shape_cast %31 : vector<1x32xf32> to vector<1x32xf32>
    %33 = vector.broadcast %32 : vector<1x32xf32> to vector<8x32xf32>
    %34 = vector.extract_strided_slice %1 {offsets = [5, 0], sizes = [1, 32], strides = [1, 1]} : vector<16x32xf32> to vector<1x32xf32>
    %35 = vector.shape_cast %34 : vector<1x32xf32> to vector<1x32xf32>
    %36 = vector.broadcast %35 : vector<1x32xf32> to vector<8x32xf32>
    %37 = vector.extract_strided_slice %1 {offsets = [6, 0], sizes = [1, 32], strides = [1, 1]} : vector<16x32xf32> to vector<1x32xf32>
    %38 = vector.shape_cast %37 : vector<1x32xf32> to vector<1x32xf32>
    %39 = vector.broadcast %38 : vector<1x32xf32> to vector<8x32xf32>
    %40 = vector.extract_strided_slice %1 {offsets = [7, 0], sizes = [1, 32], strides = [1, 1]} : vector<16x32xf32> to vector<1x32xf32>
    %41 = vector.shape_cast %40 : vector<1x32xf32> to vector<1x32xf32>
    %42 = vector.broadcast %41 : vector<1x32xf32> to vector<8x32xf32>
    %43 = vector.extract_strided_slice %2 {offsets = [4, 0], sizes = [1, 32], strides = [1, 1]} : vector<16x32xf32> to vector<1x32xf32>
    %44 = vector.shape_cast %43 : vector<1x32xf32> to vector<1x32xf32>
    %45 = vector.broadcast %44 : vector<1x32xf32> to vector<8x32xf32>
    %46 = vector.extract_strided_slice %2 {offsets = [5, 0], sizes = [1, 32], strides = [1, 1]} : vector<16x32xf32> to vector<1x32xf32>
    %47 = vector.shape_cast %46 : vector<1x32xf32> to vector<1x32xf32>
    %48 = vector.broadcast %47 : vector<1x32xf32> to vector<8x32xf32>
    %49 = vector.extract_strided_slice %2 {offsets = [6, 0], sizes = [1, 32], strides = [1, 1]} : vector<16x32xf32> to vector<1x32xf32>
    %50 = vector.shape_cast %49 : vector<1x32xf32> to vector<1x32xf32>
    %51 = vector.broadcast %50 : vector<1x32xf32> to vector<8x32xf32>
    %52 = vector.extract_strided_slice %2 {offsets = [7, 0], sizes = [1, 32], strides = [1, 1]} : vector<16x32xf32> to vector<1x32xf32>
    %53 = vector.shape_cast %52 : vector<1x32xf32> to vector<1x32xf32>
    %54 = vector.broadcast %53 : vector<1x32xf32> to vector<8x32xf32>
    %55 = vector.extract_strided_slice %3 {offsets = [1, 0], sizes = [1, 32], strides = [1, 1]} : vector<4x32xf32> to vector<1x32xf32>
    %56 = vector.shape_cast %55 : vector<1x32xf32> to vector<1x32xf32>
    %57 = vector.broadcast %56 : vector<1x32xf32> to vector<8x32xf32>
    %58 = vector.extract_strided_slice %1 {offsets = [8, 0], sizes = [1, 32], strides = [1, 1]} : vector<16x32xf32> to vector<1x32xf32>
    %59 = vector.shape_cast %58 : vector<1x32xf32> to vector<1x32xf32>
    %60 = vector.broadcast %59 : vector<1x32xf32> to vector<8x32xf32>
    %61 = vector.extract_strided_slice %1 {offsets = [9, 0], sizes = [1, 32], strides = [1, 1]} : vector<16x32xf32> to vector<1x32xf32>
    %62 = vector.shape_cast %61 : vector<1x32xf32> to vector<1x32xf32>
    %63 = vector.broadcast %62 : vector<1x32xf32> to vector<8x32xf32>
    %64 = vector.extract_strided_slice %1 {offsets = [10, 0], sizes = [1, 32], strides = [1, 1]} : vector<16x32xf32> to vector<1x32xf32>
    %65 = vector.shape_cast %64 : vector<1x32xf32> to vector<1x32xf32>
    %66 = vector.broadcast %65 : vector<1x32xf32> to vector<8x32xf32>
    %67 = vector.extract_strided_slice %1 {offsets = [11, 0], sizes = [1, 32], strides = [1, 1]} : vector<16x32xf32> to vector<1x32xf32>
    %68 = vector.shape_cast %67 : vector<1x32xf32> to vector<1x32xf32>
    %69 = vector.broadcast %68 : vector<1x32xf32> to vector<8x32xf32>
    %70 = vector.extract_strided_slice %2 {offsets = [8, 0], sizes = [1, 32], strides = [1, 1]} : vector<16x32xf32> to vector<1x32xf32>
    %71 = vector.shape_cast %70 : vector<1x32xf32> to vector<1x32xf32>
    %72 = vector.broadcast %71 : vector<1x32xf32> to vector<8x32xf32>
    %73 = vector.extract_strided_slice %2 {offsets = [9, 0], sizes = [1, 32], strides = [1, 1]} : vector<16x32xf32> to vector<1x32xf32>
    %74 = vector.shape_cast %73 : vector<1x32xf32> to vector<1x32xf32>
    %75 = vector.broadcast %74 : vector<1x32xf32> to vector<8x32xf32>
    %76 = vector.extract_strided_slice %2 {offsets = [10, 0], sizes = [1, 32], strides = [1, 1]} : vector<16x32xf32> to vector<1x32xf32>
    %77 = vector.shape_cast %76 : vector<1x32xf32> to vector<1x32xf32>
    %78 = vector.broadcast %77 : vector<1x32xf32> to vector<8x32xf32>
    %79 = vector.extract_strided_slice %2 {offsets = [11, 0], sizes = [1, 32], strides = [1, 1]} : vector<16x32xf32> to vector<1x32xf32>
    %80 = vector.shape_cast %79 : vector<1x32xf32> to vector<1x32xf32>
    %81 = vector.broadcast %80 : vector<1x32xf32> to vector<8x32xf32>
    %82 = vector.extract_strided_slice %3 {offsets = [2, 0], sizes = [1, 32], strides = [1, 1]} : vector<4x32xf32> to vector<1x32xf32>
    %83 = vector.shape_cast %82 : vector<1x32xf32> to vector<1x32xf32>
    %84 = vector.broadcast %83 : vector<1x32xf32> to vector<8x32xf32>
    %85 = vector.extract_strided_slice %1 {offsets = [12, 0], sizes = [1, 32], strides = [1, 1]} : vector<16x32xf32> to vector<1x32xf32>
    %86 = vector.shape_cast %85 : vector<1x32xf32> to vector<1x32xf32>
    %87 = vector.broadcast %86 : vector<1x32xf32> to vector<8x32xf32>
    %88 = vector.extract_strided_slice %1 {offsets = [13, 0], sizes = [1, 32], strides = [1, 1]} : vector<16x32xf32> to vector<1x32xf32>
    %89 = vector.shape_cast %88 : vector<1x32xf32> to vector<1x32xf32>
    %90 = vector.broadcast %89 : vector<1x32xf32> to vector<8x32xf32>
    %91 = vector.extract_strided_slice %1 {offsets = [14, 0], sizes = [1, 32], strides = [1, 1]} : vector<16x32xf32> to vector<1x32xf32>
    %92 = vector.shape_cast %91 : vector<1x32xf32> to vector<1x32xf32>
    %93 = vector.broadcast %92 : vector<1x32xf32> to vector<8x32xf32>
    %94 = vector.extract_strided_slice %1 {offsets = [15, 0], sizes = [1, 32], strides = [1, 1]} : vector<16x32xf32> to vector<1x32xf32>
    %95 = vector.shape_cast %94 : vector<1x32xf32> to vector<1x32xf32>
    %96 = vector.broadcast %95 : vector<1x32xf32> to vector<8x32xf32>
    %97 = vector.extract_strided_slice %2 {offsets = [12, 0], sizes = [1, 32], strides = [1, 1]} : vector<16x32xf32> to vector<1x32xf32>
    %98 = vector.shape_cast %97 : vector<1x32xf32> to vector<1x32xf32>
    %99 = vector.broadcast %98 : vector<1x32xf32> to vector<8x32xf32>
    %100 = vector.extract_strided_slice %2 {offsets = [13, 0], sizes = [1, 32], strides = [1, 1]} : vector<16x32xf32> to vector<1x32xf32>
    %101 = vector.shape_cast %100 : vector<1x32xf32> to vector<1x32xf32>
    %102 = vector.broadcast %101 : vector<1x32xf32> to vector<8x32xf32>
    %103 = vector.extract_strided_slice %2 {offsets = [14, 0], sizes = [1, 32], strides = [1, 1]} : vector<16x32xf32> to vector<1x32xf32>
    %104 = vector.shape_cast %103 : vector<1x32xf32> to vector<1x32xf32>
    %105 = vector.broadcast %104 : vector<1x32xf32> to vector<8x32xf32>
    %106 = vector.extract_strided_slice %2 {offsets = [15, 0], sizes = [1, 32], strides = [1, 1]} : vector<16x32xf32> to vector<1x32xf32>
    %107 = vector.shape_cast %106 : vector<1x32xf32> to vector<1x32xf32>
    %108 = vector.broadcast %107 : vector<1x32xf32> to vector<8x32xf32>
    %109 = vector.extract_strided_slice %3 {offsets = [3, 0], sizes = [1, 32], strides = [1, 1]} : vector<4x32xf32> to vector<1x32xf32>
    %110 = vector.shape_cast %109 : vector<1x32xf32> to vector<1x32xf32>
    %111 = vector.broadcast %110 : vector<1x32xf32> to vector<8x32xf32>
    %c0_6 = arith.constant 0 : index
    %c0_7 = arith.constant 0 : index
    %c0_8 = arith.constant 0 : index
    %112 = vector.load %arg1[%c0_6, %c0_7, %c0_8] : memref<2x8x4xf32, #tpu.memory_space<vmem>>, vector<1x8x4xf32>
    %113 = vector.shape_cast %112 : vector<1x8x4xf32> to vector<8x4xf32>
    %c1 = arith.constant 1 : index
    %c0_9 = arith.constant 0 : index
    %c0_10 = arith.constant 0 : index
    %114 = vector.load %arg1[%c1, %c0_9, %c0_10] : memref<2x8x4xf32, #tpu.memory_space<vmem>>, vector<1x8x4xf32>
    %115 = vector.shape_cast %114 : vector<1x8x4xf32> to vector<8x4xf32>
    %116 = vector.extract_strided_slice %113 {offsets = [0, 0], sizes = [8, 1], strides = [1, 1]} : vector<8x4xf32> to vector<8x1xf32>
    %117 = vector.broadcast %116 : vector<8x1xf32> to vector<8x32xf32>
    %118 = arith.mulf %117, %6 : vector<8x32xf32>
    %119 = arith.addf %118, %30 : vector<8x32xf32>
    %120 = vector.extract_strided_slice %113 {offsets = [0, 1], sizes = [8, 1], strides = [1, 1]} : vector<8x4xf32> to vector<8x1xf32>
    %121 = vector.broadcast %120 : vector<8x1xf32> to vector<8x32xf32>
    %122 = arith.mulf %121, %9 : vector<8x32xf32>
    %123 = arith.addf %119, %122 : vector<8x32xf32>
    %124 = vector.extract_strided_slice %113 {offsets = [0, 2], sizes = [8, 1], strides = [1, 1]} : vector<8x4xf32> to vector<8x1xf32>
    %125 = vector.broadcast %124 : vector<8x1xf32> to vector<8x32xf32>
    %126 = arith.mulf %125, %12 : vector<8x32xf32>
    %127 = arith.addf %123, %126 : vector<8x32xf32>
    %128 = vector.extract_strided_slice %113 {offsets = [0, 3], sizes = [8, 1], strides = [1, 1]} : vector<8x4xf32> to vector<8x1xf32>
    %129 = vector.broadcast %128 : vector<8x1xf32> to vector<8x32xf32>
    %130 = arith.mulf %129, %15 : vector<8x32xf32>
    %131 = arith.addf %127, %130 : vector<8x32xf32>
    %132 = math.tanh %131 : vector<8x32xf32>
    %cst = arith.constant 1.000000e+00 : f32
    %133 = vector.broadcast %cst : f32 to vector<8x32xf32>
    %134 = arith.addf %132, %133 : vector<8x32xf32>
    %135 = arith.mulf %134, %18 : vector<8x32xf32>
    %cst_11 = arith.constant dense<0.000000e+00> : vector<8xf32>
    %136 = vector.multi_reduction <add>, %135, %cst_11 [1] : vector<8x32xf32> to vector<8xf32>
    %137 = vector.shape_cast %136 : vector<8xf32> to vector<8x1xf32>
    %138 = arith.mulf %134, %21 : vector<8x32xf32>
    %cst_12 = arith.constant dense<0.000000e+00> : vector<8xf32>
    %139 = vector.multi_reduction <add>, %138, %cst_12 [1] : vector<8x32xf32> to vector<8xf32>
    %140 = vector.shape_cast %139 : vector<8xf32> to vector<8x1xf32>
    %141 = arith.mulf %134, %24 : vector<8x32xf32>
    %cst_13 = arith.constant dense<0.000000e+00> : vector<8xf32>
    %142 = vector.multi_reduction <add>, %141, %cst_13 [1] : vector<8x32xf32> to vector<8xf32>
    %143 = vector.shape_cast %142 : vector<8xf32> to vector<8x1xf32>
    %144 = arith.mulf %134, %27 : vector<8x32xf32>
    %cst_14 = arith.constant dense<0.000000e+00> : vector<8xf32>
    %145 = vector.multi_reduction <add>, %144, %cst_14 [1] : vector<8x32xf32> to vector<8xf32>
    %146 = vector.shape_cast %145 : vector<8xf32> to vector<8x1xf32>
    %147 = tpu.concatenate %137, %140, %143, %146 in 1 : vector<8x1xf32>, vector<8x1xf32>, vector<8x1xf32>, vector<8x1xf32> -> vector<8x4xf32>
    %148 = vector.broadcast %0 : f32 to vector<8x4xf32>
    %149 = arith.mulf %147, %148 : vector<8x4xf32>
    %150 = arith.addf %115, %149 : vector<8x4xf32>
    %151 = vector.extract_strided_slice %150 {offsets = [0, 0], sizes = [8, 1], strides = [1, 1]} : vector<8x4xf32> to vector<8x1xf32>
    %152 = vector.broadcast %151 : vector<8x1xf32> to vector<8x32xf32>
    %153 = arith.mulf %152, %33 : vector<8x32xf32>
    %154 = arith.addf %153, %57 : vector<8x32xf32>
    %155 = vector.extract_strided_slice %150 {offsets = [0, 1], sizes = [8, 1], strides = [1, 1]} : vector<8x4xf32> to vector<8x1xf32>
    %156 = vector.broadcast %155 : vector<8x1xf32> to vector<8x32xf32>
    %157 = arith.mulf %156, %36 : vector<8x32xf32>
    %158 = arith.addf %154, %157 : vector<8x32xf32>
    %159 = vector.extract_strided_slice %150 {offsets = [0, 2], sizes = [8, 1], strides = [1, 1]} : vector<8x4xf32> to vector<8x1xf32>
    %160 = vector.broadcast %159 : vector<8x1xf32> to vector<8x32xf32>
    %161 = arith.mulf %160, %39 : vector<8x32xf32>
    %162 = arith.addf %158, %161 : vector<8x32xf32>
    %163 = vector.extract_strided_slice %150 {offsets = [0, 3], sizes = [8, 1], strides = [1, 1]} : vector<8x4xf32> to vector<8x1xf32>
    %164 = vector.broadcast %163 : vector<8x1xf32> to vector<8x32xf32>
    %165 = arith.mulf %164, %42 : vector<8x32xf32>
    %166 = arith.addf %162, %165 : vector<8x32xf32>
    %167 = math.tanh %166 : vector<8x32xf32>
    %cst_15 = arith.constant 1.000000e+00 : f32
    %168 = vector.broadcast %cst_15 : f32 to vector<8x32xf32>
    %169 = arith.addf %167, %168 : vector<8x32xf32>
    %170 = arith.mulf %169, %45 : vector<8x32xf32>
    %cst_16 = arith.constant dense<0.000000e+00> : vector<8xf32>
    %171 = vector.multi_reduction <add>, %170, %cst_16 [1] : vector<8x32xf32> to vector<8xf32>
    %172 = vector.shape_cast %171 : vector<8xf32> to vector<8x1xf32>
    %173 = arith.mulf %169, %48 : vector<8x32xf32>
    %cst_17 = arith.constant dense<0.000000e+00> : vector<8xf32>
    %174 = vector.multi_reduction <add>, %173, %cst_17 [1] : vector<8x32xf32> to vector<8xf32>
    %175 = vector.shape_cast %174 : vector<8xf32> to vector<8x1xf32>
    %176 = arith.mulf %169, %51 : vector<8x32xf32>
    %cst_18 = arith.constant dense<0.000000e+00> : vector<8xf32>
    %177 = vector.multi_reduction <add>, %176, %cst_18 [1] : vector<8x32xf32> to vector<8xf32>
    %178 = vector.shape_cast %177 : vector<8xf32> to vector<8x1xf32>
    %179 = arith.mulf %169, %54 : vector<8x32xf32>
    %cst_19 = arith.constant dense<0.000000e+00> : vector<8xf32>
    %180 = vector.multi_reduction <add>, %179, %cst_19 [1] : vector<8x32xf32> to vector<8xf32>
    %181 = vector.shape_cast %180 : vector<8xf32> to vector<8x1xf32>
    %182 = tpu.concatenate %172, %175, %178, %181 in 1 : vector<8x1xf32>, vector<8x1xf32>, vector<8x1xf32>, vector<8x1xf32> -> vector<8x4xf32>
    %183 = vector.broadcast %0 : f32 to vector<8x4xf32>
    %184 = arith.mulf %182, %183 : vector<8x4xf32>
    %185 = arith.addf %113, %184 : vector<8x4xf32>
    %186 = vector.extract_strided_slice %185 {offsets = [0, 0], sizes = [8, 1], strides = [1, 1]} : vector<8x4xf32> to vector<8x1xf32>
    %187 = vector.broadcast %186 : vector<8x1xf32> to vector<8x32xf32>
    %188 = arith.mulf %187, %60 : vector<8x32xf32>
    %189 = arith.addf %188, %84 : vector<8x32xf32>
    %190 = vector.extract_strided_slice %185 {offsets = [0, 1], sizes = [8, 1], strides = [1, 1]} : vector<8x4xf32> to vector<8x1xf32>
    %191 = vector.broadcast %190 : vector<8x1xf32> to vector<8x32xf32>
    %192 = arith.mulf %191, %63 : vector<8x32xf32>
    %193 = arith.addf %189, %192 : vector<8x32xf32>
    %194 = vector.extract_strided_slice %185 {offsets = [0, 2], sizes = [8, 1], strides = [1, 1]} : vector<8x4xf32> to vector<8x1xf32>
    %195 = vector.broadcast %194 : vector<8x1xf32> to vector<8x32xf32>
    %196 = arith.mulf %195, %66 : vector<8x32xf32>
    %197 = arith.addf %193, %196 : vector<8x32xf32>
    %198 = vector.extract_strided_slice %185 {offsets = [0, 3], sizes = [8, 1], strides = [1, 1]} : vector<8x4xf32> to vector<8x1xf32>
    %199 = vector.broadcast %198 : vector<8x1xf32> to vector<8x32xf32>
    %200 = arith.mulf %199, %69 : vector<8x32xf32>
    %201 = arith.addf %197, %200 : vector<8x32xf32>
    %202 = math.tanh %201 : vector<8x32xf32>
    %cst_20 = arith.constant 1.000000e+00 : f32
    %203 = vector.broadcast %cst_20 : f32 to vector<8x32xf32>
    %204 = arith.addf %202, %203 : vector<8x32xf32>
    %205 = arith.mulf %204, %72 : vector<8x32xf32>
    %cst_21 = arith.constant dense<0.000000e+00> : vector<8xf32>
    %206 = vector.multi_reduction <add>, %205, %cst_21 [1] : vector<8x32xf32> to vector<8xf32>
    %207 = vector.shape_cast %206 : vector<8xf32> to vector<8x1xf32>
    %208 = arith.mulf %204, %75 : vector<8x32xf32>
    %cst_22 = arith.constant dense<0.000000e+00> : vector<8xf32>
    %209 = vector.multi_reduction <add>, %208, %cst_22 [1] : vector<8x32xf32> to vector<8xf32>
    %210 = vector.shape_cast %209 : vector<8xf32> to vector<8x1xf32>
    %211 = arith.mulf %204, %78 : vector<8x32xf32>
    %cst_23 = arith.constant dense<0.000000e+00> : vector<8xf32>
    %212 = vector.multi_reduction <add>, %211, %cst_23 [1] : vector<8x32xf32> to vector<8xf32>
    %213 = vector.shape_cast %212 : vector<8xf32> to vector<8x1xf32>
    %214 = arith.mulf %204, %81 : vector<8x32xf32>
    %cst_24 = arith.constant dense<0.000000e+00> : vector<8xf32>
    %215 = vector.multi_reduction <add>, %214, %cst_24 [1] : vector<8x32xf32> to vector<8xf32>
    %216 = vector.shape_cast %215 : vector<8xf32> to vector<8x1xf32>
    %217 = tpu.concatenate %207, %210, %213, %216 in 1 : vector<8x1xf32>, vector<8x1xf32>, vector<8x1xf32>, vector<8x1xf32> -> vector<8x4xf32>
    %218 = vector.broadcast %0 : f32 to vector<8x4xf32>
    %219 = arith.mulf %217, %218 : vector<8x4xf32>
    %220 = arith.addf %150, %219 : vector<8x4xf32>
    %221 = vector.extract_strided_slice %220 {offsets = [0, 0], sizes = [8, 1], strides = [1, 1]} : vector<8x4xf32> to vector<8x1xf32>
    %222 = vector.broadcast %221 : vector<8x1xf32> to vector<8x32xf32>
    %223 = arith.mulf %222, %87 : vector<8x32xf32>
    %224 = arith.addf %223, %111 : vector<8x32xf32>
    %225 = vector.extract_strided_slice %220 {offsets = [0, 1], sizes = [8, 1], strides = [1, 1]} : vector<8x4xf32> to vector<8x1xf32>
    %226 = vector.broadcast %225 : vector<8x1xf32> to vector<8x32xf32>
    %227 = arith.mulf %226, %90 : vector<8x32xf32>
    %228 = arith.addf %224, %227 : vector<8x32xf32>
    %229 = vector.extract_strided_slice %220 {offsets = [0, 2], sizes = [8, 1], strides = [1, 1]} : vector<8x4xf32> to vector<8x1xf32>
    %230 = vector.broadcast %229 : vector<8x1xf32> to vector<8x32xf32>
    %231 = arith.mulf %230, %93 : vector<8x32xf32>
    %232 = arith.addf %228, %231 : vector<8x32xf32>
    %233 = vector.extract_strided_slice %220 {offsets = [0, 3], sizes = [8, 1], strides = [1, 1]} : vector<8x4xf32> to vector<8x1xf32>
    %234 = vector.broadcast %233 : vector<8x1xf32> to vector<8x32xf32>
    %235 = arith.mulf %234, %96 : vector<8x32xf32>
    %236 = arith.addf %232, %235 : vector<8x32xf32>
    %237 = math.tanh %236 : vector<8x32xf32>
    %cst_25 = arith.constant 1.000000e+00 : f32
    %238 = vector.broadcast %cst_25 : f32 to vector<8x32xf32>
    %239 = arith.addf %237, %238 : vector<8x32xf32>
    %240 = arith.mulf %239, %99 : vector<8x32xf32>
    %cst_26 = arith.constant dense<0.000000e+00> : vector<8xf32>
    %241 = vector.multi_reduction <add>, %240, %cst_26 [1] : vector<8x32xf32> to vector<8xf32>
    %242 = vector.shape_cast %241 : vector<8xf32> to vector<8x1xf32>
    %243 = arith.mulf %239, %102 : vector<8x32xf32>
    %cst_27 = arith.constant dense<0.000000e+00> : vector<8xf32>
    %244 = vector.multi_reduction <add>, %243, %cst_27 [1] : vector<8x32xf32> to vector<8xf32>
    %245 = vector.shape_cast %244 : vector<8xf32> to vector<8x1xf32>
    %246 = arith.mulf %239, %105 : vector<8x32xf32>
    %cst_28 = arith.constant dense<0.000000e+00> : vector<8xf32>
    %247 = vector.multi_reduction <add>, %246, %cst_28 [1] : vector<8x32xf32> to vector<8xf32>
    %248 = vector.shape_cast %247 : vector<8xf32> to vector<8x1xf32>
    %249 = arith.mulf %239, %108 : vector<8x32xf32>
    %cst_29 = arith.constant dense<0.000000e+00> : vector<8xf32>
    %250 = vector.multi_reduction <add>, %249, %cst_29 [1] : vector<8x32xf32> to vector<8xf32>
    %251 = vector.shape_cast %250 : vector<8xf32> to vector<8x1xf32>
    %252 = tpu.concatenate %242, %245, %248, %251 in 1 : vector<8x1xf32>, vector<8x1xf32>, vector<8x1xf32>, vector<8x1xf32> -> vector<8x4xf32>
    %253 = vector.broadcast %0 : f32 to vector<8x4xf32>
    %254 = arith.mulf %252, %253 : vector<8x4xf32>
    %255 = arith.addf %185, %254 : vector<8x4xf32>
    %c0_30 = arith.constant 0 : index
    %c0_31 = arith.constant 0 : index
    %c0_32 = arith.constant 0 : index
    %256 = vector.load %arg5[%c0_30, %c0_31, %c0_32] : memref<2x8x4xf32, #tpu.memory_space<vmem>>, vector<1x8x4xf32>
    %257 = vector.shape_cast %256 : vector<1x8x4xf32> to vector<8x4xf32>
    %258 = vector.shape_cast %255 : vector<8x4xf32> to vector<1x8x4xf32>
    tpu.vector_store %arg5[%c0_30, %c0_31, %c0_32], %258 {strides = array<i32>} : memref<2x8x4xf32, #tpu.memory_space<vmem>>, vector<1x8x4xf32>,
    %c1_33 = arith.constant 1 : index
    %c0_34 = arith.constant 0 : index
    %c0_35 = arith.constant 0 : index
    %259 = vector.load %arg5[%c1_33, %c0_34, %c0_35] : memref<2x8x4xf32, #tpu.memory_space<vmem>>, vector<1x8x4xf32>
    %260 = vector.shape_cast %259 : vector<1x8x4xf32> to vector<8x4xf32>
    %261 = vector.shape_cast %220 : vector<8x4xf32> to vector<1x8x4xf32>
    tpu.vector_store %arg5[%c1_33, %c0_34, %c0_35], %261 {strides = array<i32>} : memref<2x8x4xf32, #tpu.memory_space<vmem>>, vector<1x8x4xf32>,
    return
  }
}

</mosaic_0001>

<bundles_post_ra>
// kernel: sympnet_forward.1
= control target key start
LH: loop header
LB: loop body
LE: loop exit
PB: predicated region body
PF: predicated region fallthrough
CT: control target
= control target key end

     0   :  { %v409_v0 = vmov 0   ;;  %v410_v2 = vmov 2   ;;  %v411_v3 = vmov 1   ;;  %v412_v4 = vmov 3   ;;  %s654_s1 = inlined_call_operand.vmem [shape: f32[2,8,4], index: 1, kind: input, shape index: {}, may-alias: {1,5}]   ;;  %s655_s2 = inlined_call_operand.vmem [shape: f32[16,32], index: 2, kind: input, shape index: {}]   ;;  %s656_s4 = inlined_call_operand.vmem [shape: f32[4,32], index: 4, kind: input, shape index: {}]   ;;  %s657_s3 = inlined_call_operand.vmem [shape: f32[16,32], index: 3, kind: input, shape index: {}]   ;;  %s658_s0 = inlined_call_operand.<no memory space> [shape: f32[1], index: 0, kind: input, shape index: {}]   ;;  %s659_s5 = inlined_call_operand.vmem [shape: f32[2,8,4], index: 5, kind: output, shape index: {}, may-alias: {1,5}]  }
   0x1   :  { %385 = vset.pattern.permute.xlu0 %v409_v0  ;;  %v447_v1 = vld [vmem:[%s654_s1] sm:$0xff]  ;;  %387 = vset.pattern.permute.xlu1 %v410_v2  ;;  %v27_v5 = vlaneseq  ;;  %vm202_vm0 = vcmask 261120   ;;  %vm218_vm1 = vcmask 7168   ;;  %vm220_vm2 = vcmask 15360   ;;  %v379_v52 = vld [vmem:[%s654_s1 + $0x8] sm:$0xff] }
   0x2   :  { %176 = vperm.xlu0 %385, %v447_v1   ;;  %188 = vperm.xlu1 %387, %v447_v1   ;;  %v466_v8 = vld [vmem:[%s655_s2] sm:$0xff]  ;;  %vm222_vm3 = vcmask 23552   ;;  %v513_v50 = vstv %s658_s0  ;;  %vm371_vm4 = vcmask 31744  }
   0x3   :  { %v458_v6 = vshrl.u32 %v27_v5, 7  ;;  %v476_v11 = vld [vmem:[%s656_s4] sm:$0xf] }
   0x4   :  { %v495_v30 = vld [vmem:[%s657_s3] sm:$0xff] }
   0x5   :  { %v461_v7 = vsub.s32 0, %v458_v6  ;;  %v471_v10 = vsub.s32 1, %v458_v6  ;;  %v479_v13 = vsub.s32 2, %v458_v6  ;;  %v482_v15 = vsub.s32 3, %v458_v6 }
   0x6   :  { %386 = vset.pattern.permute.xlu0 %v411_v3  ;;  %388 = vset.pattern.permute.xlu1 %v412_v4  ;;  %v532_v56 = vsub.s32 4, %v458_v6  ;;  %v535_v57 = vsub.s32 5, %v458_v6  ;;  %v542_v60 = vsub.s32 6, %v458_v6 }
   0x7   :  { %182 = vperm.xlu0 %386, %v447_v1   ;;  %194 = vperm.xlu1 %388, %v447_v1   ;;  %v30_v9 = vrot.slane %v466_v8, %v461_v7  ;;  %v62_v16 = vrot.slane %v476_v11, %v461_v7  ;;  %v34_v18 = vrot.slane %v466_v8, %v471_v10 }
   0x8   :  { %v38_v19 = vrot.slane %v466_v8, %v479_v13  ;;  %v42_v20 = vrot.slane %v466_v8, %v482_v15  ;;  %v50_v31 = vrot.slane %v495_v30, %v471_v10  ;;  %v46_v32 = vrot.slane %v495_v30, %v461_v7 }
   0x9   :  { %v54_v35 = vrot.slane %v495_v30, %v479_v13  ;;  %v58_v36 = vrot.slane %v495_v30, %v482_v15  ;;  %v66_v58 = vrot.slane %v466_v8, %v532_v56  ;;  %v98_v59 = vrot.slane %v476_v11, %v471_v10 }
   0xa   :  { %v70_v63 = vrot.slane %v466_v8, %v535_v57 }
   0xb   :  { %390 = vset.pattern.permute.xlu1 %v411_v3  ;;  %389 = vset.pattern.permute.xlu0 %v409_v0 }
  0x81   :  { %v177_v12 = vpop.permute.xlu0 %176  ;;  %v189_v14 = vpop.permute.xlu1 %188 }
  0x82   :  { %v179_v17 = vmul.f32 %v177_v12, %v30_v9  ;;  %v191_v25 = vmul.f32 %v189_v14, %v38_v19  ;;  %v74_v9 = vrot.slane %v466_v8, %v542_v60  ;;  %v549_v12 = vsub.s32 7, %v458_v6 }
  0x84   :  { %v180_v23 = vadd.f32 %v179_v17, %v62_v16  ;;  %v78_v19 = vrot.slane %v466_v8, %v549_v12 }
  0x86   :  { %v183_v21 = vpop.permute.xlu0 %182  ;;  %v195_v22 = vpop.permute.xlu1 %194 }
  0x87   :  { %v185_v24 = vmul.f32 %v183_v21, %v34_v18  ;;  %v197_v27 = vmul.f32 %v195_v22, %v42_v20 }
  0x89   :  { %v186_v26 = vadd.f32 %v185_v24, %v180_v23  ;;  %v86_v24 = vrot.slane %v495_v30, %v535_v57 }
  0x8b   :  { %v192_v28 = vadd.f32 %v191_v25, %v186_v26  ;;  %v82_v25 = vrot.slane %v495_v30, %v532_v56 }
  0x8d   :  { %v198_v29 = vadd.f32 %v197_v27, %v192_v28  ;;  %v90_v27 = vrot.slane %v495_v30, %v542_v60 }
  0x8f   :  { %401 = vtanh.f32 %v198_v29 }
  0x99   :  { %v402_v33 = vpop.eup %401 }
  0x9a   :  { %v200_v34 = vadd.f32 1.0, %v402_v33  ;;  %v94_v33 = vrot.slane %v495_v30, %v549_v12 }
  0x9c   :  { %v206_v37 = vmul.f32 %v200_v34, %v50_v31  ;;  %v201_v38 = vmul.f32 %v200_v34, %v46_v32  ;;  %v210_v41 = vmul.f32 %v200_v34, %v54_v35  ;;  %v214_v42 = vmul.f32 %v200_v34, %v58_v36 }
  0x9e   :  { %v207_v39 = vsel %vm202_vm0, %v206_v37, 0.0  ;;  %v203_v40 = vsel %vm202_vm0, %v201_v38, 0.0  ;;  %v211_v43 = vsel %vm202_vm0, %v210_v41, 0.0  ;;  %v215_v44 = vsel %vm202_vm0, %v214_v42, 0.0 }
  0x9f   :  { %208 = vadd.xlane.f32.xlu0 %v207_v39  ;;  %204 = vadd.xlane.f32.xlu1 %v203_v40 }
  0xa3   :  { %212 = vadd.xlane.f32.xlu0 %v211_v43  ;;  %216 = vadd.xlane.f32.xlu1 %v215_v44 }
 0x12c   :  { %v209_v45 = vpop.xlane.xlu0 %208  ;;  %v205_v46 = vpop.xlane.xlu1 %204 }
 0x12d   :  { %v219_v47 = vsel %vm218_vm1, %v205_v46, %v209_v45  ;;  %v582_v45 = vld [vmem:[%s655_s2 + $0x8] sm:$0xff]  ;;  %v134_v46 = vrot.slane %v476_v11, %v479_v13 }
 0x130   :  { %v213_v48 = vpop.xlane.xlu0 %212  ;;  %v217_v49 = vpop.xlane.xlu1 %216 }
 0x131   :  { %v221_v51 = vsel %vm220_vm2, %v219_v47, %v213_v48  ;;  %v106_v48 = vrot.slane %v582_v45, %v471_v10 }
 0x132   :  { %v223_v53 = vsel %vm222_vm3, %v221_v51, %v217_v49 }
 0x133   :  { %v225_v54 = vmul.f32 %v513_v50, %v223_v53 }
 0x135   :  { %v521_v55 = vadd.f32 %v379_v52, %v225_v54 }
 0x137   :  { %235 = vperm.xlu1 %390, %v521_v55   ;;  %229 = vperm.xlu0 %389, %v521_v55  }
 0x13b   :  { %391 = vset.pattern.permute.xlu1 %v410_v2  ;;  %394 = vset.pattern.permute.xlu0 %v411_v3 }
 0x13c   :  { %241 = vperm.xlu1 %391, %v521_v55  }
 0x140   :  { %392 = vset.pattern.permute.xlu1 %v412_v4 }
 0x141   :  { %247 = vperm.xlu1 %392, %v521_v55  }
 0x145   :  { %393 = vset.pattern.permute.xlu1 %v409_v0 }
 0x1b6   :  { %v236_v61 = vpop.permute.xlu1 %235  ;;  %v230_v62 = vpop.permute.xlu0 %229 }
 0x1b7   :  { %v232_v3 = vmul.f32 %v230_v62, %v66_v58  ;;  %v238_v14 = vmul.f32 %v236_v61, %v70_v63  ;;  %v114_v61 = vrot.slane %v582_v45, %v482_v15 }
 0x1b9   :  { %v233_v5 = vadd.f32 %v232_v3, %v98_v59 }
 0x1bb   :  { %v242_v16 = vpop.permute.xlu1 %241  ;;  %v239_v17 = vadd.f32 %v238_v14, %v233_v5 }
 0x1bc   :  { %v244_v18 = vmul.f32 %v242_v16, %v74_v9  ;;  %v597_v9 = vld [vmem:[%s657_s3 + $0x8] sm:$0xff] }
 0x1bd   :  { %v122_v14 = vrot.slane %v597_v9, %v471_v10  ;;  %v118_v16 = vrot.slane %v597_v9, %v461_v7 }
 0x1be   :  { %v245_v21 = vadd.f32 %v244_v18, %v239_v17 }
 0x1c0   :  { %v248_v20 = vpop.permute.xlu1 %247 }
 0x1c1   :  { %v250_v22 = vmul.f32 %v248_v20, %v78_v19  ;;  %v126_v19 = vrot.slane %v597_v9, %v479_v13 }
 0x1c3   :  { %v251_v23 = vadd.f32 %v250_v22, %v245_v21 }
 0x1c5   :  { %403 = vtanh.f32 %v251_v23 }
 0x1cf   :  { %v404_v6 = vpop.eup %403 }
 0x1d0   :  { %v253_v26 = vadd.f32 1.0, %v404_v6 }
 0x1d2   :  { %v258_v28 = vmul.f32 %v253_v26, %v86_v24  ;;  %v254_v29 = vmul.f32 %v253_v26, %v82_v25  ;;  %v262_v32 = vmul.f32 %v253_v26, %v90_v27  ;;  %v266_v35 = vmul.f32 %v253_v26, %v94_v33 }
 0x1d3   :  { %v130_v25 = vrot.slane %v597_v9, %v482_v15 }
 0x1d4   :  { %v259_v8 = vsel %vm202_vm0, %v258_v28, 0.0  ;;  %v255_v31 = vsel %vm202_vm0, %v254_v29, 0.0  ;;  %v263_v34 = vsel %vm202_vm0, %v262_v32, 0.0  ;;  %v267_v36 = vsel %vm202_vm0, %v266_v35, 0.0 }
 0x1d5   :  { %260 = vadd.xlane.f32.xlu0 %v259_v8  ;;  %256 = vadd.xlane.f32.xlu1 %v255_v31 }
 0x1d9   :  { %264 = vadd.xlane.f32.xlu1 %v263_v34  ;;  %v138_v34 = vrot.slane %v582_v45, %v532_v56 }
 0x1dd   :  { %268 = vadd.xlane.f32.xlu1 %v267_v36  ;;  %v142_v36 = vrot.slane %v582_v45, %v535_v57 }
 0x262   :  { %v257_v37 = vpop.xlane.xlu1 %256  ;;  %v261_v38 = vpop.xlane.xlu0 %260 }
 0x263   :  { %v270_v40 = vsel %vm218_vm1, %v257_v37, %v261_v38 }
 0x266   :  { %v265_v39 = vpop.xlane.xlu1 %264 }
 0x267   :  { %v271_v41 = vsel %vm220_vm2, %v270_v40, %v265_v39 }
 0x26a   :  { %v269_v42 = vpop.xlane.xlu1 %268 }
 0x26b   :  { %v272_v43 = vsel %vm222_vm3, %v271_v41, %v269_v42 }
 0x26c   :  { %v273_v30 = vmul.f32 %v272_v43, %v513_v50  ;;  %v150_v43 = vrot.slane %v582_v45, %v549_v12 }
 0x26e   :  { %v570_v44 = vadd.f32 %v273_v30, %v447_v1  ;;  %v102_v1 = vrot.slane %v582_v45, %v461_v7 }
 0x270   :  { %283 = vperm.xlu0 %394, %v570_v44   ;;  %277 = vperm.xlu1 %393, %v570_v44  }
 0x274   :  { %395 = vset.pattern.permute.xlu1 %v410_v2 }
 0x275   :  { %289 = vperm.xlu1 %395, %v570_v44  }
 0x279   :  { %396 = vset.pattern.permute.xlu1 %v412_v4 }
 0x27a   :  { %295 = vperm.xlu1 %396, %v570_v44  }
 0x27e   :  { %397 = vset.pattern.permute.xlu1 %v409_v0  ;;  %v110_v0 = vrot.slane %v582_v45, %v479_v13 }
 0x2ef   :  { %v278_v47 = vpop.permute.xlu1 %277  ;;  %v284_v51 = vpop.permute.xlu0 %283 }
 0x2f0   :  { %v280_v49 = vmul.f32 %v278_v47, %v102_v1  ;;  %v286_v53 = vmul.f32 %v284_v51, %v106_v48  ;;  %v154_v47 = vrot.slane %v597_v9, %v532_v56  ;;  %v166_v51 = vrot.slane %v597_v9, %v549_v12 }
 0x2f2   :  { %v281_v52 = vadd.f32 %v280_v49, %v134_v46  ;;  %v158_v46 = vrot.slane %v597_v9, %v535_v57 }
 0x2f4   :  { %v290_v54 = vpop.permute.xlu1 %289  ;;  %v287_v58 = vadd.f32 %v286_v53, %v281_v52  ;;  %v162_v52 = vrot.slane %v597_v9, %v542_v60 }
 0x2f5   :  { %v292_v59 = vmul.f32 %v290_v54, %v110_v0 }
 0x2f7   :  { %v293_v63 = vadd.f32 %v292_v59, %v287_v58 }
 0x2f9   :  { %v296_v62 = vpop.permute.xlu1 %295 }
 0x2fa   :  { %v298_v3 = vmul.f32 %v296_v62, %v114_v61 }
 0x2fc   :  { %v299_v5 = vadd.f32 %v298_v3, %v293_v63 }
 0x2fe   :  { %405 = vtanh.f32 %v299_v5 }
 0x308   :  { %v406_v17 = vpop.eup %405 }
 0x309   :  { %v301_v18 = vadd.f32 1.0, %v406_v17 }
 0x30b   :  { %v306_v20 = vmul.f32 %v301_v18, %v122_v14  ;;  %v302_v21 = vmul.f32 %v301_v18, %v118_v16  ;;  %v310_v24 = vmul.f32 %v301_v18, %v126_v19  ;;  %v314_v7 = vmul.f32 %v301_v18, %v130_v25 }
 0x30d   :  { %v307_v22 = vsel %vm202_vm0, %v306_v20, 0.0  ;;  %v303_v23 = vsel %vm202_vm0, %v302_v21, 0.0  ;;  %v311_v10 = vsel %vm202_vm0, %v310_v24, 0.0  ;;  %v315_v6 = vsel %vm202_vm0, %v314_v7, 0.0 }
 0x30e   :  { %308 = vadd.xlane.f32.xlu0 %v307_v22  ;;  %304 = vadd.xlane.f32.xlu1 %v303_v23 }
 0x312   :  { %312 = vadd.xlane.f32.xlu1 %v311_v10 }
 0x316   :  { %316 = vadd.xlane.f32.xlu1 %v315_v6 }
 0x39b   :  { %v305_v13 = vpop.xlane.xlu1 %304  ;;  %v309_v26 = vpop.xlane.xlu0 %308 }
 0x39c   :  { %v318_v28 = vsel %vm218_vm1, %v305_v13, %v309_v26 }
 0x39f   :  { %v313_v27 = vpop.xlane.xlu1 %312 }
 0x3a0   :  { %v319_v29 = vsel %vm220_vm2, %v318_v28, %v313_v27 }
 0x3a3   :  { %v317_v8 = vpop.xlane.xlu1 %316 }
 0x3a4   :  { %v320_v31 = vsel %vm222_vm3, %v319_v29, %v317_v8 }
 0x3a5   :  { %v321_v32 = vmul.f32 %v320_v31, %v513_v50 }
 0x3a7   :  { %v322_v33 = vadd.f32 %v321_v32, %v521_v55  ;;  %v170_v55 = vrot.slane %v476_v11, %v482_v15 }
 0x3a9   :  { %380 = vst.msk [vmem:[%s659_s5 + $0x8] sm:$0xff] %vm371_vm4, %v322_v33  ;;  %331 = vperm.xlu0 %394, %v322_v33   ;;  %325 = vperm.xlu1 %397, %v322_v33  }
 0x3ad   :  { %398 = vset.pattern.permute.xlu1 %v410_v2  ;;  %400 = vset.pattern.permute.xlu0 %v412_v4  ;;  %v146_v2 = vrot.slane %v582_v45, %v542_v60 }
 0x3ae   :  { %337 = vperm.xlu1 %398, %v322_v33  }
 0x3b2   :  { %399 = vset.pattern.permute.xlu1 %v412_v4 }
 0x3b3   :  { %343 = vperm.xlu1 %399, %v322_v33  }
 0x428   :  { %v326_v35 = vpop.permute.xlu1 %325  ;;  %v332_v38 = vpop.permute.xlu0 %331 }
 0x429   :  { %v328_v37 = vmul.f32 %v326_v35, %v138_v34  ;;  %v334_v40 = vmul.f32 %v332_v38, %v142_v36 }
 0x42b   :  { %v329_v39 = vadd.f32 %v328_v37, %v170_v55 }
 0x42d   :  { %v338_v41 = vpop.permute.xlu1 %337  ;;  %v335_v4 = vadd.f32 %v334_v40, %v329_v39 }
 0x42e   :  { %v340_v42 = vmul.f32 %v338_v41, %v146_v2 }
 0x430   :  { %v341_v1 = vadd.f32 %v340_v42, %v335_v4 }
 0x432   :  { %v344_v30 = vpop.permute.xlu1 %343 }
 0x433   :  { %v346_v11 = vmul.f32 %v344_v30, %v150_v43 }
 0x435   :  { %v347_v15 = vadd.f32 %v346_v11, %v341_v1 }
 0x437   :  { %407 = vtanh.f32 %v347_v15 }
 0x441   :  { %v408_v48 = vpop.eup %407 }
 0x442   :  { %v349_v49 = vadd.f32 1.0, %v408_v48 }
 0x444   :  { %v354_v45 = vmul.f32 %v349_v49, %v158_v46  ;;  %v350_v0 = vmul.f32 %v349_v49, %v154_v47  ;;  %v362_v58 = vmul.f32 %v349_v49, %v166_v51  ;;  %v358_v59 = vmul.f32 %v349_v49, %v162_v52 }
 0x446   :  { %v355_v53 = vsel %vm202_vm0, %v354_v45, 0.0  ;;  %v351_v54 = vsel %vm202_vm0, %v350_v0, 0.0  ;;  %v363_v56 = vsel %vm202_vm0, %v362_v58, 0.0  ;;  %v359_v57 = vsel %vm202_vm0, %v358_v59, 0.0 }
 0x447   :  { %356 = vadd.xlane.f32.xlu0 %v355_v53  ;;  %352 = vadd.xlane.f32.xlu1 %v351_v54 }
 0x44b   :  { %364 = vadd.xlane.f32.xlu0 %v363_v56  ;;  %360 = vadd.xlane.f32.xlu1 %v359_v57 }
 0x4d4   :  { %v357_v12 = vpop.xlane.xlu0 %356  ;;  %v353_v61 = vpop.xlane.xlu1 %352 }
 0x4d5   :  { %v366_v60 = vsel %vm218_vm1, %v353_v61, %v357_v12 }
 0x4d8   :  { %v365_v62 = vpop.xlane.xlu0 %364  ;;  %v361_v63 = vpop.xlane.xlu1 %360 }
 0x4d9   :  { %v367_v3 = vsel %vm220_vm2, %v366_v60, %v361_v63 }
 0x4da   :  { %v368_v5 = vsel %vm222_vm3, %v367_v3, %v365_v62 }
 0x4db   :  { %v369_v9 = vmul.f32 %v368_v5, %v513_v50 }
 0x4dd   :  { %v370_v14 = vadd.f32 %v369_v9, %v570_v44 }
 0x4df   :  { %372 = vst.msk [vmem:[%s659_s5] sm:$0xff] %vm371_vm4, %v370_v14 }

</bundles_post_ra>
